<compile_context>
chip_gen: v7x
topology: tpu7x:2x2x1
jax: 0.10.0
libtpu: 0.0.40
codegen_flags: <defaults>
</compile_context>

<pallas_src>
import math
from functools import partial

import jax
import jax.numpy as jnp
from jax.experimental import pallas as pl
from jax.experimental.pallas import tpu as pltpu

_VMEM_LIMIT = 48 * 1024 * 1024


def _round_up(x, m):
    return (x + m - 1) // m * m


# ----------------------------------------------------------------------------
# Pallas kernels
# ----------------------------------------------------------------------------
@partial(jax.jit, static_argnames=("out_dtype",))
def pallas_matmul(a, b, bias=None, out_dtype=jnp.bfloat16):
    """[M,K] @ [K,N] (+ bias) -> [M,N].  bf16 MXU operands, f32 accumulation.

    Resident-B: the whole weight matrix is a single constant-index block
    (fetched once); A streams over a 1-D grid of M tiles.  Block dims equal
    the full K / N extents, so there is no K remainder and no masking; the M
    remainder relies on Pallas' discard-on-OOB-write semantics.
    """
    M, K = a.shape
    K2, N = b.shape
    assert K == K2
    a = a.astype(jnp.bfloat16)
    b = b.astype(jnp.bfloat16)
    if bias is None:
        bias2 = jnp.zeros((1, N), jnp.float32)
    else:
        bias2 = bias.reshape(1, N).astype(jnp.float32)
    tm = min(512, _round_up(M, 8))

    def kernel(a_ref, b_ref, bias_ref, o_ref):
        acc = jnp.dot(a_ref[...], b_ref[...],
                      preferred_element_type=jnp.float32)
        o_ref[...] = (acc + bias_ref[...]).astype(o_ref.dtype)

    return pl.pallas_call(
        kernel,
        out_shape=jax.ShapeDtypeStruct((M, N), out_dtype),
        grid_spec=pltpu.PrefetchScalarGridSpec(
            num_scalar_prefetch=0,
            grid=(pl.cdiv(M, tm),),
            in_specs=[pl.BlockSpec((tm, K), lambda i: (i, 0)),
                      pl.BlockSpec((K, N), lambda i: (0, 0)),
                      pl.BlockSpec((1, N), lambda i: (0, 0))],
            out_specs=pl.BlockSpec((tm, N), lambda i: (i, 0))),
        compiler_params=pltpu.CompilerParams(
            dimension_semantics=("parallel",),
            vmem_limit_bytes=_VMEM_LIMIT),
    )(a, b, bias2)


@partial(jax.jit, static_argnums=(2, 3))
def pallas_gwc_volume(left, right, maxdisp_div, num_groups):
    """Group-wise correlation volume, emitted directly in [B, D, H, W, G].

    out[b,d,h,w,g] = mean_{c in group g} left[b,h,w,c] * right[b,h,w-d,c]
    (zero where w < d), matching build_gwc_volume.  bf16 MXU operands,
    f32 accumulation, bf16 output.  No D-fold feature replication and no
    post-hoc transpose.
    """
    B, H, W, C = left.shape
    D, G = maxdisp_div, num_groups
    cpg = C // G
    l = left.astype(jnp.bfloat16)
    rpad = jnp.pad(right.astype(jnp.bfloat16), ((0, 0), (0, 0), (D, 0), (0, 0)))
    avg = (jnp.repeat(jnp.eye(G, dtype=jnp.float32), cpg, axis=0)
           / cpg).astype(jnp.bfloat16)                     # [C, G]

    def kernel(l_ref, r_ref, a_ref, o_ref):
        lv = l_ref[...]                                    # [W, C] bf16
        av = a_ref[...]                                    # [C, G] bf16
        for d in range(D):                                 # static unroll
            prod = lv * r_ref[D - d:D - d + W, :]
            o_ref[d, :, :] = jnp.dot(
                prod, av, preferred_element_type=jnp.float32).astype(o_ref.dtype)

    return pl.pallas_call(
        kernel,
        out_shape=jax.ShapeDtypeStruct((B, D, H, W, G), jnp.bfloat16),
        grid_spec=pltpu.PrefetchScalarGridSpec(
            num_scalar_prefetch=0, grid=(B, H),
            in_specs=[pl.BlockSpec((None, None, W, C), lambda b, h: (b, h, 0, 0)),
                      pl.BlockSpec((None, None, W + D, C), lambda b, h: (b, h, 0, 0)),
                      pl.BlockSpec((C, G), lambda b, h: (0, 0))],
            out_specs=pl.BlockSpec((None, D, None, W, G),
                                   lambda b, h: (b, 0, h, 0, 0))),
        compiler_params=pltpu.CompilerParams(
            dimension_semantics=("parallel", "parallel"),
            vmem_limit_bytes=_VMEM_LIMIT),
    )(l, rpad, avg)


@partial(jax.jit, static_argnums=(2,))
def pallas_corr_volume(left, right, maxdisp_div):
    """G=1 correlation volume, emitted directly in [B, H, W, D] (lane-dense).

    out[b,h,w,d] = mean_c left[b,h,w,c] * right[b,h,w-d,c] (zero where w < d).
    Channel reduction on the VPU/XLU (no 1-column MXU matmul).
    """
    B, H, W, C = left.shape
    D = maxdisp_div
    l = left.astype(jnp.bfloat16)
    rpad = jnp.pad(right.astype(jnp.bfloat16), ((0, 0), (0, 0), (D, 0), (0, 0)))
    inv_c = 1.0 / C

    def kernel(l_ref, r_ref, o_ref):
        lv = l_ref[...].astype(jnp.float32)                # [W, C]
        cols = []
        for d in range(D):                                 # static unroll
            prod = lv * r_ref[D - d:D - d + W, :].astype(jnp.float32)
            cols.append(jnp.sum(prod, axis=-1, keepdims=True) * inv_c)
        o_ref[...] = jnp.concatenate(cols, axis=-1).astype(o_ref.dtype)

    return pl.pallas_call(
        kernel,
        out_shape=jax.ShapeDtypeStruct((B, H, W, D), jnp.bfloat16),
        grid_spec=pltpu.PrefetchScalarGridSpec(
            num_scalar_prefetch=0, grid=(B, H),
            in_specs=[pl.BlockSpec((None, None, W, C), lambda b, h: (b, h, 0, 0)),
                      pl.BlockSpec((None, None, W + D, C), lambda b, h: (b, h, 0, 0))],
            out_specs=pl.BlockSpec((None, None, W, D), lambda b, h: (b, h, 0, 0))),
        compiler_params=pltpu.CompilerParams(
            dimension_semantics=("parallel", "parallel"),
            vmem_limit_bytes=_VMEM_LIMIT),
    )(l, rpad)


@jax.jit
def pallas_patch32(x, w):
    """Grouped Conv3d(32,32,(1,3,3),groups=32,pad=(0,1,1),dilation=1).

    x: [B, D, H, W, 32]; w: torch layout [32, 1, 1, 3, 3].  The 9 taps are
    accumulated in a local value and stored once (no o_ref read-modify-write).
    """
    B, D, H, W, C = x.shape
    R = B * D
    xp = jnp.pad(x.astype(jnp.bfloat16).reshape(R, H, W, C),
                 ((0, 0), (1, 1), (1, 1), (0, 0)))
    Hp, Wp = H + 2, W + 2
    w9 = jnp.transpose(w[:, 0, 0, :, :], (1, 2, 0)).reshape(9, C).astype(jnp.float32)

    def kernel(x_ref, w_ref, o_ref):
        wv = w_ref[...]                                    # [9, C]
        acc = x_ref[0:H, 0:W, :].astype(jnp.float32) * wv[0]
        for k in range(1, 9):
            i, j = divmod(k, 3)
            acc = acc + x_ref[i:i + H, j:j + W, :].astype(jnp.float32) * wv[k]
        o_ref[...] = acc.astype(o_ref.dtype)

    out = pl.pallas_call(
        kernel,
        out_shape=jax.ShapeDtypeStruct((R, H, W, C), jnp.bfloat16),
        grid_spec=pltpu.PrefetchScalarGridSpec(
            num_scalar_prefetch=0, grid=(R,),
            in_specs=[pl.BlockSpec((None, Hp, Wp, C), lambda i: (i, 0, 0, 0)),
                      pl.BlockSpec((9, C), lambda i: (0, 0))],
            out_specs=pl.BlockSpec((None, H, W, C), lambda i: (i, 0, 0, 0))),
        compiler_params=pltpu.CompilerParams(
            dimension_semantics=("parallel",),
            vmem_limit_bytes=_VMEM_LIMIT),
    )(xp, w9)
    return out.reshape(B, D, H, W, C)


@jax.jit
def pallas_patch_l_fused(x, w_l1, w_l2, w_l3):
    """Fused patch_l1/l2/l3 grouped (1,3,3) convs (dilations 1/2/3 on channel
    slices 0:8 / 8:24 / 24:32) in a single pass over all 32 channels.

    Reads x once and writes the concatenated patch_volume once; cross-group
    taps are zeroed in the weight table so no lane slicing / concat is needed.
    """
    B, D, H, W, C = x.shape
    R = B * D
    P = 3                                                  # max dilation pad
    xp = jnp.pad(x.astype(jnp.bfloat16).reshape(R, H, W, C),
                 ((0, 0), (P, P), (P, P), (0, 0)))
    Hp, Wp = H + 2 * P, W + 2 * P

    def to9(w):                                            # [c,1,1,3,3] -> [9,c]
        return jnp.transpose(w[:, 0, 0, :, :], (1, 2, 0)).reshape(9, -1)

    wc = jnp.zeros((3, 9, C), jnp.float32)
    wc = wc.at[0, :, 0:8].set(to9(w_l1).astype(jnp.float32))
    wc = wc.at[1, :, 8:24].set(to9(w_l2).astype(jnp.float32))
    wc = wc.at[2, :, 24:32].set(to9(w_l3).astype(jnp.float32))
    dils = (1, 2, 3)

    def kernel(x_ref, w_ref, o_ref):
        wv = w_ref[...]                                    # [3, 9, C]
        acc = jnp.zeros((H, W, C), jnp.float32)
        for g, dil in enumerate(dils):
            off = P - dil
            for k in range(9):
                i, j = divmod(k, 3)
                sl = x_ref[off + i * dil:off + i * dil + H,
                           off + j * dil:off + j * dil + W, :].astype(jnp.float32)
                acc = acc + sl * wv[g, k]
        o_ref[...] = acc.astype(o_ref.dtype)

    out = pl.pallas_call(
        kernel,
        out_shape=jax.ShapeDtypeStruct((R, H, W, C), jnp.bfloat16),
        grid_spec=pltpu.PrefetchScalarGridSpec(
            num_scalar_prefetch=0, grid=(R,),
            in_specs=[pl.BlockSpec((None, Hp, Wp, C), lambda i: (i, 0, 0, 0)),
                      pl.BlockSpec((3, 9, C), lambda i: (0, 0, 0))],
            out_specs=pl.BlockSpec((None, H, W, C), lambda i: (i, 0, 0, 0))),
        compiler_params=pltpu.CompilerParams(
            dimension_semantics=("parallel",),
            vmem_limit_bytes=_VMEM_LIMIT),
    )(xp, wc)
    return out.reshape(B, D, H, W, C)


@jax.jit
def pallas_interp_softmax_mul(att, w_interp, corr):
    """softmax(att @ w_interp, axis=-1) * corr, fused (D-interp in-kernel).

    att: [B,H,W,Din] (bf16 ok), w_interp: [Din,Dout], corr: [B,H,W,Dout].
    Softmax math in f32; bf16 inputs/outputs."""
    B, H, W, Din = att.shape
    Dout = corr.shape[-1]
    M = B * H * W
    a2 = att.astype(jnp.bfloat16).reshape(M, Din)
    c2 = corr.astype(jnp.bfloat16).reshape(M, Dout)
    wb = w_interp.astype(jnp.bfloat16)
    tm = min(2048, _round_up(M, 8))

    def kernel(a_ref, w_ref, c_ref, o_ref):
        logits = jnp.dot(a_ref[...], w_ref[...],
                         preferred_element_type=jnp.float32)
        m = jnp.max(logits, axis=-1, keepdims=True)
        e = jnp.exp(logits - m)
        s = jnp.sum(e, axis=-1, keepdims=True)
        o_ref[...] = ((e / s) * c_ref[...].astype(jnp.float32)).astype(o_ref.dtype)

    out = pl.pallas_call(
        kernel,
        out_shape=jax.ShapeDtypeStruct((M, Dout), jnp.bfloat16),
        grid_spec=pltpu.PrefetchScalarGridSpec(
            num_scalar_prefetch=0, grid=(pl.cdiv(M, tm),),
            in_specs=[pl.BlockSpec((tm, Din), lambda i: (i, 0)),
                      pl.BlockSpec((Din, Dout), lambda i: (0, 0)),
                      pl.BlockSpec((tm, Dout), lambda i: (i, 0))],
            out_specs=pl.BlockSpec((tm, Dout), lambda i: (i, 0))),
        compiler_params=pltpu.CompilerParams(
            dimension_semantics=("parallel",),
            vmem_limit_bytes=_VMEM_LIMIT),
    )(a2, wb, c2)
    return out.reshape(B, H, W, Dout)


@jax.jit
def pallas_interp_softmax_disparity(x, w_interp):
    """Fused: linear D-interp (x @ w_interp) + softmax over D + disparity
    regression.  x: [B,H,W,Din] (bf16 ok); w_interp: [Din,Dmax] -> [B,H,W] f32."""
    B, H, W, Din = x.shape
    Dout = w_interp.shape[1]
    M = B * H * W
    x2 = x.astype(jnp.bfloat16).reshape(M, Din)
    wb = w_interp.astype(jnp.bfloat16)
    rows = min(2048, _round_up(M, 8))

    def kernel(x_ref, w_ref, o_ref):
        logits = jnp.dot(x_ref[...], w_ref[...],
                         preferred_element_type=jnp.float32)
        m = jnp.max(logits, axis=-1, keepdims=True)
        e = jnp.exp(logits - m)
        s = jnp.sum(e, axis=-1, keepdims=True)
        d = jax.lax.broadcasted_iota(jnp.float32, e.shape, 1)
        num = jnp.sum(e * d, axis=-1, keepdims=True)
        o_ref[...] = num / s

    out = pl.pallas_call(
        kernel,
        out_shape=jax.ShapeDtypeStruct((M, 1), jnp.float32),
        grid_spec=pltpu.PrefetchScalarGridSpec(
            num_scalar_prefetch=0, grid=(pl.cdiv(M, rows),),
            in_specs=[pl.BlockSpec((rows, Din), lambda i: (i, 0)),
                      pl.BlockSpec((Din, Dout), lambda i: (0, 0))],
            out_specs=pl.BlockSpec((rows, 1), lambda i: (i, 0))),
        compiler_params=pltpu.CompilerParams(
            dimension_semantics=("parallel",),
            vmem_limit_bytes=_VMEM_LIMIT),
    )(x2, wb)
    return out.reshape(B, H, W)


# ----------------------------------------------------------------------------
# Basic NN ops (im2col glue in JAX, matmul hot path in Pallas, bf16 activations)
# ----------------------------------------------------------------------------
def relu(x):
    return jnp.maximum(x, 0.0)


def leaky_relu(x, slope=0.1):
    return jnp.where(x >= 0, x, slope * x)


def batchnorm2d(x, eps=1e-5):
    xf = x.astype(jnp.float32)
    mean = jnp.mean(xf, axis=(0, 1, 2), keepdims=True)
    var = jnp.var(xf, axis=(0, 1, 2), keepdims=True)
    return ((xf - mean) * jax.lax.rsqrt(var + eps)).astype(x.dtype)


def batchnorm3d(x, eps=1e-5):
    xf = x.astype(jnp.float32)
    mean = jnp.mean(xf, axis=(0, 1, 2, 3), keepdims=True)
    var = jnp.var(xf, axis=(0, 1, 2, 3), keepdims=True)
    return ((xf - mean) * jax.lax.rsqrt(var + eps)).astype(x.dtype)


# TODO(synk): replace host-side im2col with implicit im2col (haloed DMA) inside
#             the Pallas matmul to avoid the kh*kw(*kd)-fold patch matrix in HBM.
@partial(jax.jit, static_argnames=("stride", "padding", "dilation"))
def conv2d(x, w, bias=None, stride=1, padding=0, dilation=1):
    """x: NHWC, w: PyTorch (Cout, Cin, kh, kw).  bf16 im2col + Pallas matmul
    (bias fused into the matmul epilogue, bf16 output)."""
    B, H, W, Cin = x.shape
    Cout, _, kh, kw = w.shape
    s, p, d = stride, padding, dilation
    xb = x.astype(jnp.bfloat16)
    xp = jnp.pad(xb, ((0, 0), (p, p), (p, p), (0, 0)))
    Ho = (H + 2 * p - d * (kh - 1) - 1) // s + 1
    Wo = (W + 2 * p - d * (kw - 1) - 1) // s + 1
    cols = []
    for i in range(kh):
        for j in range(kw):
            cols.append(xp[:, i * d:i * d + (Ho - 1) * s + 1:s,
                           j * d:j * d + (Wo - 1) * s + 1:s, :])
    patches = jnp.concatenate(cols, axis=-1).reshape(-1, kh * kw * Cin)
    wmat = jnp.transpose(w, (2, 3, 1, 0)).reshape(kh * kw * Cin, Cout)
    out = pallas_matmul(patches, wmat, bias)
    return out.reshape(B, Ho, Wo, Cout)


@partial(jax.jit, static_argnames=("stride", "padding"))
def conv3d(x, w, bias=None, stride=1, padding=0):
    """x: NDHWC, w: PyTorch (Cout, Cin, kd, kh, kw)."""
    B, D, H, W, Cin = x.shape
    Cout, _, kd, kh, kw = w.shape
    s, p = stride, padding
    xb = x.astype(jnp.bfloat16)
    xp = jnp.pad(xb, ((0, 0), (p, p), (p, p), (p, p), (0, 0)))
    Do = (D + 2 * p - kd) // s + 1
    Ho = (H + 2 * p - kh) // s + 1
    Wo = (W + 2 * p - kw) // s + 1
    cols = []
    for a in range(kd):
        for i in range(kh):
            for j in range(kw):
                cols.append(xp[:, a:a + (Do - 1) * s + 1:s,
                               i:i + (Ho - 1) * s + 1:s,
                               j:j + (Wo - 1) * s + 1:s, :])
    patches = jnp.concatenate(cols, axis=-1).reshape(-1, kd * kh * kw * Cin)
    wmat = jnp.transpose(w, (2, 3, 4, 1, 0)).reshape(kd * kh * kw * Cin, Cout)
    out = pallas_matmul(patches, wmat, bias)
    return out.reshape(B, Do, Ho, Wo, Cout)


# TODO(synk): use an output-parity (sub-pixel) decomposition instead of
#             zero-upsampling for stride-2 transposed convs.
def conv_transpose2d(x, w, stride, padding, output_padding, bias=None):
    """x: NHWC, w: PyTorch ConvTranspose2d (Cin, Cout, kh, kw)."""
    B, H, W, Cin = x.shape
    _, Cout, kh, kw = w.shape
    s = stride
    xd = jnp.zeros((B, (H - 1) * s + 1, (W - 1) * s + 1, Cin), jnp.bfloat16)
    xd = xd.at[:, ::s, ::s, :].set(x.astype(jnp.bfloat16))
    pb = kh - 1 - padding
    pa = pb + output_padding
    xd = jnp.pad(xd, ((0, 0), (pb, pa), (pb, pa), (0, 0)))
    wc = jnp.transpose(w[:, :, ::-1, ::-1], (1, 0, 2, 3))
    return conv2d(xd, wc, bias=bias, stride=1, padding=0)


def conv_transpose3d(x, w, stride, padding, output_padding):
    """x: NDHWC, w: PyTorch ConvTranspose3d (Cin, Cout, kd, kh, kw)."""
    B, D, H, W, Cin = x.shape
    _, Cout, kd, kh, kw = w.shape
    s = stride
    xd = jnp.zeros((B, (D - 1) * s + 1, (H - 1) * s + 1, (W - 1) * s + 1, Cin),
                   jnp.bfloat16)
    xd = xd.at[:, ::s, ::s, ::s, :].set(x.astype(jnp.bfloat16))
    pb = kd - 1 - padding
    pa = pb + output_padding
    xd = jnp.pad(xd, ((0, 0), (pb, pa), (pb, pa), (pb, pa), (0, 0)))
    wc = jnp.transpose(w[:, :, ::-1, ::-1, ::-1], (1, 0, 2, 3, 4))
    return conv3d(xd, wc, stride=1, padding=0)


def _linear_resize_axis(x, axis, out_size):
    """F.interpolate(linear, align_corners=False) along one axis, in x.dtype."""
    in_size = x.shape[axis]
    if in_size == out_size:
        return x
    scale = in_size / out_size
    dst = jnp.arange(out_size, dtype=jnp.float32)
    src = jnp.clip((dst + 0.5) * scale - 0.5, 0.0, in_size - 1.0)
    lo = jnp.floor(src).astype(jnp.int32)
    hi = jnp.minimum(lo + 1, in_size - 1)
    wgt = (src - lo.astype(jnp.float32)).astype(x.dtype)
    wshape = [1] * x.ndim
    wshape[axis] = out_size
    wgt = wgt.reshape(wshape)
    return (jnp.take(x, lo, axis=axis) * (1.0 - wgt)
            + jnp.take(x, hi, axis=axis) * wgt)


def _linear_interp_matrix(in_size, out_size):
    """[in_size, out_size] matrix equivalent to _linear_resize_axis."""
    if in_size == out_size:
        return jnp.eye(in_size, dtype=jnp.float32)
    scale = in_size / out_size
    dst = jnp.arange(out_size, dtype=jnp.float32)
    src = jnp.clip((dst + 0.5) * scale - 0.5, 0.0, in_size - 1.0)
    lo = jnp.floor(src).astype(jnp.int32)
    hi = jnp.minimum(lo + 1, in_size - 1)
    wgt = src - lo.astype(jnp.float32)
    m_lo = jax.nn.one_hot(lo, in_size, dtype=jnp.float32) * (1.0 - wgt)[:, None]
    m_hi = jax.nn.one_hot(hi, in_size, dtype=jnp.float32) * wgt[:, None]
    return (m_lo + m_hi).T


# ----------------------------------------------------------------------------
# Parameter generation (deterministic, mirrors the PyTorch init loop)
# ----------------------------------------------------------------------------
class ParamGen:
    def __init__(self, seed=0):
        self._key = jax.random.PRNGKey(seed)

    def normal(self, shape, std):
        self._key, k = jax.random.split(self._key)
        return std * jax.random.normal(k, shape, jnp.float32)


def conv2d_weight(pg, cin, cout, k):
    n = k * k * cout
    return pg.normal((cout, cin, k, k), math.sqrt(2.0 / n))


def conv3d_weight(pg, cin_per_group, cout, kd, kh, kw):
    n = kd * kh * kw * cout
    return pg.normal((cout, cin_per_group, kd, kh, kw), math.sqrt(2.0 / n))


def convT2d_weight(pg, cin, cout, k):
    n = k * k * cout
    return pg.normal((cin, cout, k, k), math.sqrt(2.0 / n))


def convT3d_weight(pg, cin, cout, k):
    n = k * k * k * cout
    return pg.normal((cin, cout, k, k, k), math.sqrt(2.0 / n))


# ----------------------------------------------------------------------------
# Model blocks
# ----------------------------------------------------------------------------
def make_convbn(pg, cin, cout, k, stride, pad, dilation):
    padding = dilation if dilation > 1 else pad
    return dict(w=conv2d_weight(pg, cin, cout, k), stride=stride,
                padding=padding, dilation=dilation)


def apply_convbn(p, x):
    return batchnorm2d(conv2d(x, p['w'], stride=p['stride'],
                              padding=p['padding'], dilation=p['dilation']))


def make_basic_block(pg, inplanes, planes, stride, with_downsample, pad, dilation):
    p = dict(conv1=make_convbn(pg, inplanes, planes, 3, stride, pad, dilation),
             conv2=make_convbn(pg, planes, planes, 3, 1, pad, dilation),
             downsample=None)
    if with_downsample:
        p['downsample'] = dict(w=conv2d_weight(pg, inplanes, planes, 1),
                               stride=stride)
    return p


def apply_basic_block(p, x):
    out = relu(apply_convbn(p['conv1'], x))
    out = apply_convbn(p['conv2'], out)
    if p['downsample'] is not None:
        x = batchnorm2d(conv2d(x, p['downsample']['w'],
                               stride=p['downsample']['stride'], padding=0))
    return out + x


def make_feature_extraction(pg):
    firstconv = [make_convbn(pg, 3, 32, 3, 2, 1, 1),
                 make_convbn(pg, 32, 32, 3, 1, 1, 1),
                 make_convbn(pg, 32, 32, 3, 1, 1, 1)]
    state = dict(inplanes=32)

    def make_layer(planes, blocks, stride, pad, dilation):
        inplanes = state['inplanes']
        need_ds = (stride != 1 or inplanes != planes)
        layers = [make_basic_block(pg, inplanes, planes, stride, need_ds, pad, dilation)]
        state['inplanes'] = planes
        for _ in range(1, blocks):
            layers.append(make_basic_block(pg, planes, planes, 1, False, pad, dilation))
        return layers

    return dict(firstconv=firstconv,
                layer1=make_layer(32, 3, 1, 1, 1),
                layer2=make_layer(64, 16, 2, 1, 1),
                layer3=make_layer(128, 3, 2, 1, 1),
                layer4=make_layer(128, 3, 1, 1, 2))


def apply_feature_extraction(p, x):
    for c in p['firstconv']:
        x = relu(apply_convbn(c, x))
    for b in p['layer1']:
        x = apply_basic_block(b, x)
    l2 = x
    for b in p['layer2']:
        l2 = apply_basic_block(b, l2)
    l3 = l2
    for b in p['layer3']:
        l3 = apply_basic_block(b, l3)
    l4 = l3
    for b in p['layer4']:
        l4 = apply_basic_block(b, l4)
    gwc_feature = jnp.concatenate([l3, l4], axis=-1)   # 256 channels @ 1/8
    return gwc_feature, l2                              # corr_feature = l2 @ 1/4


def make_convbn3d(pg, cin, cout, k, stride, pad):
    return dict(w=conv3d_weight(pg, cin, cout, k, k, k), stride=stride, pad=pad)


def apply_convbn3d(p, x):
    return batchnorm3d(conv3d(x, p['w'], stride=p['stride'], padding=p['pad']))


def make_hourglass(pg, c):
    return dict(conv1=make_convbn3d(pg, c, 2 * c, 3, 2, 1),
                conv2=make_convbn3d(pg, 2 * c, 2 * c, 3, 1, 1),
                conv3=make_convbn3d(pg, 2 * c, 4 * c, 3, 2, 1),
                conv4=make_convbn3d(pg, 4 * c, 4 * c, 3, 1, 1),
                conv5_w=convT3d_weight(pg, 4 * c, 2 * c, 3),
                conv6_w=convT3d_weight(pg, 2 * c, c, 3),
                redir1=make_convbn3d(pg, c, c, 1, 1, 0),
                redir2=make_convbn3d(pg, 2 * c, 2 * c, 1, 1, 0))


def apply_hourglass(p, x):
    c1 = relu(apply_convbn3d(p['conv1'], x))
    c2 = relu(apply_convbn3d(p['conv2'], c1))
    c3 = relu(apply_convbn3d(p['conv3'], c2))
    c4 = relu(apply_convbn3d(p['conv4'], c3))
    c5 = relu(batchnorm3d(conv_transpose3d(c4, p['conv5_w'], 2, 1, 1))
              + apply_convbn3d(p['redir2'], c2))
    c6 = relu(batchnorm3d(conv_transpose3d(c5, p['conv6_w'], 2, 1, 1))
              + apply_convbn3d(p['redir1'], x))
    return c6


def make_resblock(pg, cin, cout, stride=1):
    p = dict(w1=conv2d_weight(pg, cin, cout, 3), b1=jnp.zeros((cout,), jnp.float32),
             w2=conv2d_weight(pg, cout, cout, 3), b2=jnp.zeros((cout,), jnp.float32),
             stride=stride, shortcut=None)
    if stride != 1 or cin != cout:
        p['shortcut'] = dict(w=conv2d_weight(pg, cin, cout, 1),
                             b=jnp.zeros((cout,), jnp.float32))
    return p


def apply_resblock(p, x):
    res = x
    if p['shortcut'] is not None:
        res = batchnorm2d(conv2d(x, p['shortcut']['w'], bias=p['shortcut']['b'],
                                 stride=p['stride'], padding=0))
    out = relu(batchnorm2d(conv2d(x, p['w1'], bias=p['b1'],
                                  stride=p['stride'], padding=1)))
    out = batchnorm2d(conv2d(out, p['w2'], bias=p['b2'], stride=1, padding=1))
    return relu(out + res)


def make_origin_agg(pg):
    return dict(conv3_1=make_resblock(pg, 48, 128),
                conv4=make_resblock(pg, 128, 256, 2),
                conv4_1=make_resblock(pg, 256, 256),
                conv5=make_resblock(pg, 256, 256, 2),
                conv5_1=make_resblock(pg, 256, 256),
                conv6=make_resblock(pg, 256, 512, 2),
                conv6_1=make_resblock(pg, 512, 512),
                iconv5_w=convT2d_weight(pg, 512, 256, 3),
                iconv5_b=jnp.zeros((256,), jnp.float32),
                iconv4_w=convT2d_weight(pg, 384, 128, 3),
                iconv4_b=jnp.zeros((128,), jnp.float32),
                iconv3_w=convT2d_weight(pg, 192, 64, 3),
                iconv3_b=jnp.zeros((64,), jnp.float32),
                upconv5_w=convT2d_weight(pg, 512, 256, 4),
                upconv4_w=convT2d_weight(pg, 256, 128, 4),
                upconv3_w=convT2d_weight(pg, 128, 64, 4),
                disp3_w=conv2d_weight(pg, 64, 48, 3))


def apply_origin_agg(p, x):
    conv3b = apply_resblock(p['conv3_1'], x)
    conv4a = apply_resblock(p['conv4'], conv3b)
    conv4b = apply_resblock(p['conv4_1'], conv4a)
    conv5a = apply_resblock(p['conv5'], conv4b)
    conv5b = apply_resblock(p['conv5_1'], conv5a)
    conv6a = apply_resblock(p['conv6'], conv5b)
    conv6b = apply_resblock(p['conv6_1'], conv6a)
    up5 = leaky_relu(conv_transpose2d(conv6b, p['upconv5_w'], 2, 1, 0))
    i5 = conv_transpose2d(jnp.concatenate([up5, conv5b], axis=-1),
                          p['iconv5_w'], 1, 1, 0, bias=p['iconv5_b'])
    up4 = leaky_relu(conv_transpose2d(i5, p['upconv4_w'], 2, 1, 0))
    i4 = conv_transpose2d(jnp.concatenate([up4, conv4b], axis=-1),
                          p['iconv4_w'], 1, 1, 0, bias=p['iconv4_b'])
    up3 = leaky_relu(conv_transpose2d(i4, p['upconv3_w'], 2, 1, 0))
    i3 = conv_transpose2d(jnp.concatenate([up3, conv3b], axis=-1),
                          p['iconv3_w'], 1, 1, 0, bias=p['iconv3_b'])
    return conv2d(i3, p['disp3_w'], stride=1, padding=1)


# ----------------------------------------------------------------------------
# ACVNet
# ----------------------------------------------------------------------------
def make_acvnet_params(seed=0):
    pg = ParamGen(seed)
    return dict(
        fe=make_feature_extraction(pg),
        patch=conv3d_weight(pg, 1, 32, 1, 3, 3),      # Conv3d(32,32,(1,3,3),groups=32)
        patch_l1=conv3d_weight(pg, 1, 8, 1, 3, 3),
        patch_l2=conv3d_weight(pg, 1, 16, 1, 3, 3),
        patch_l3=conv3d_weight(pg, 1, 8, 1, 3, 3),
        dres1=[make_convbn3d(pg, 32, 32, 3, 1, 1),
               make_convbn3d(pg, 32, 32, 3, 1, 1)],
        dres2=make_hourglass(pg, 32),
        classif_att=dict(c0=make_convbn3d(pg, 32, 32, 3, 1, 1),
                         c1=conv3d_weight(pg, 32, 1, 3, 3, 3)),
        agg0=make_origin_agg(pg))


def acvnet_forward(params, left, right, maxdisp=192):
    """left/right: NHWC [B, H, W, 3].  Returns [pred_attention, pred0]."""
    B, H, W, _ = left.shape
    D8, D4, num_groups = maxdisp // 8, maxdisp // 4, 32

    gwc_l, corr_l = apply_feature_extraction(params['fe'], left)
    gwc_r, corr_r = apply_feature_extraction(params['fe'], right)

    # group-wise correlation volume, emitted directly in [B, D8, H8, W8, 32]
    gwc_vol = pallas_gwc_volume(gwc_l, gwc_r, D8, num_groups)

    # grouped (1,3,3) patch convs: single pass for `patch`, single fused pass
    # for patch_l1/l2/l3 (channel slices + concat handled in-kernel)
    gwc_vol = pallas_patch32(gwc_vol, params['patch'])
    patch_volume = pallas_patch_l_fused(gwc_vol, params['patch_l1'],
                                        params['patch_l2'], params['patch_l3'])

    # attention cost aggregation (3D)
    cost_att = apply_convbn3d(params['dres1'][0], patch_volume)
    cost_att = relu(cost_att)
    cost_att = apply_convbn3d(params['dres1'][1], cost_att)
    cost_att = apply_hourglass(params['dres2'], cost_att)
    t = relu(apply_convbn3d(params['classif_att']['c0'], cost_att))
    att_weights = conv3d(t, params['classif_att']['c1'], stride=1, padding=1)
    att = att_weights[..., 0]                                # [B, D8, H8, W8]
    att_nhwc = jnp.transpose(att, (0, 2, 3, 1))              # [B, H8, W8, D8] bf16

    # attention-weighted correlation volume at 1/4 resolution
    corr_volume = pallas_corr_volume(corr_l, corr_r, D4)     # [B,H4,W4,D4]
    H4, W4 = corr_l.shape[1], corr_l.shape[2]
    att_hw4 = _linear_resize_axis(att_nhwc, 1, H4)
    att_hw4 = _linear_resize_axis(att_hw4, 2, W4)            # [B,H4,W4,D8] bf16
    w_d8_d4 = _linear_interp_matrix(D8, D4)
    ac_volume = pallas_interp_softmax_mul(att_hw4, w_d8_d4, corr_volume)

    # 2-D aggregation
    cost0 = apply_origin_agg(params['agg0'], ac_volume)      # [B,H4,W4,48]

    # training-branch heads (D-interp fused into the Pallas softmax kernels;
    # H/W resizes run in bf16)
    # TODO(synk): fold the W-interp into the softmax kernels as a second matmul.
    att_full = _linear_resize_axis(att_nhwc, 1, H)
    att_full = _linear_resize_axis(att_full, 2, W)            # [B,H,W,D8] bf16
    w_d8_full = _linear_interp_matrix(D8, maxdisp)
    pred_attention = pallas_interp_softmax_disparity(att_full, w_d8_full)

    cost0_full = _linear_resize_axis(cost0, 1, H)
    cost0_full = _linear_resize_axis(cost0_full, 2, W)        # [B,H,W,D4] bf16
    w_d4_full = _linear_interp_matrix(D4, maxdisp)
    pred0 = pallas_interp_softmax_disparity(cost0_full, w_d4_full)
    return [pred_attention, pred0]


# ----------------------------------------------------------------------------
if __name__ == "__main__":
    key = jax.random.PRNGKey(0)
    kl, kr = jax.random.split(key)
    B, H, W = 1, 32, 32
    left = jax.random.normal(kl, (B, H, W, 3), jnp.float32)
    right = jax.random.normal(kr, (B, H, W, 3), jnp.float32)

    params = make_acvnet_params(seed=0)
    preds = acvnet_forward(params, left, right, maxdisp=192)
    preds = [jax.block_until_ready(p) for p in preds]

    assert preds[0].shape == (B, H, W) and preds[1].shape == (B, H, W)
    assert all(bool(jnp.all(jnp.isfinite(p))) for p in preds)
    print("KERNEL_OK")
</pallas_src>

<mosaic_0001>
module attributes {stable_mosaic.version = 11 : i64} {
  func.func @kernel(%arg0: i32, %arg1: memref<256x27xbf16, #tpu.memory_space<vmem>>, %arg2: memref<27x32xbf16, #tpu.memory_space<vmem>>, %arg3: memref<1x32xf32, #tpu.memory_space<vmem>>, %arg4: memref<256x32xbf16, #tpu.memory_space<vmem>>) attributes {dimension_semantics = [#tpu.dimension_semantics<parallel>], iteration_bounds = array<i64: 1>, scalar_prefetch = 0 : i64, scratch_operands = 0 : i64, tpu.core_type = #tpu.core_type<tc>, window_params = [{transform_indices = @transform_0, window_bounds = array<i64: 256, 27>}, {pipeline_mode = #tpu.pipeline_mode<synchronous>, transform_indices = @transform_1, window_bounds = array<i64: 27, 32>}, {pipeline_mode = #tpu.pipeline_mode<synchronous>, transform_indices = @transform_2, window_bounds = array<i64: 1, 32>}, {transform_indices = @transform_3, window_bounds = array<i64: 256, 32>}]} {
    %c0 = arith.constant 0 : index
    %c0_0 = arith.constant 0 : index
    %0 = vector.load %arg1[%c0, %c0_0] : memref<256x27xbf16, #tpu.memory_space<vmem>>, vector<256x27xbf16>
    %c0_1 = arith.constant 0 : index
    %c0_2 = arith.constant 0 : index
    %1 = vector.load %arg2[%c0_1, %c0_2] : memref<27x32xbf16, #tpu.memory_space<vmem>>, vector<27x32xbf16>
    %cst = arith.constant dense<0.000000e+00> : vector<256x32xf32>
    %2 = tpu.matmul %0, %1, %cst {dimension_numbers = #tpu.dot_dimension_numbers<[1], [0], [0], [1], [0, 0, 1, 1], [], []>} : vector<256x27xbf16>, vector<27x32xbf16>, vector<256x32xf32> -> vector<256x32xf32>
    %c0_3 = arith.constant 0 : index
    %c0_4 = arith.constant 0 : index
    %3 = vector.load %arg3[%c0_3, %c0_4] : memref<1x32xf32, #tpu.memory_space<vmem>>, vector<1x32xf32>
    %4 = vector.broadcast %3 : vector<1x32xf32> to vector<256x32xf32>
    %5 = arith.addf %2, %4 : vector<256x32xf32>
    %6 = arith.truncf %5 : vector<256x32xf32> to vector<256x32xbf16>
    %c0_5 = arith.constant 0 : index
    %c0_6 = arith.constant 0 : index
    %7 = vector.load %arg4[%c0_5, %c0_6] : memref<256x32xbf16, #tpu.memory_space<vmem>>, vector<256x32xbf16>
    tpu.vector_store %arg4[%c0_5, %c0_6], %6 {strides = array<i32>} : memref<256x32xbf16, #tpu.memory_space<vmem>>, vector<256x32xbf16>,
    return
  }
  func.func @transform_0(%arg0: i32) -> (i32, i32) {
    %c0_i32 = arith.constant 0 : i32
    %c0_i32_0 = arith.constant 0 : i32
    return %arg0, %c0_i32 : i32, i32
  }
  func.func @transform_1(%arg0: i32) -> (i32, i32) {
    %c0_i32 = arith.constant 0 : i32
    %c0_i32_0 = arith.constant 0 : i32
    %c0_i32_1 = arith.constant 0 : i32
    return %c0_i32, %c0_i32_0 : i32, i32
  }
  func.func @transform_2(%arg0: i32) -> (i32, i32) {
    %c0_i32 = arith.constant 0 : i32
    %c0_i32_0 = arith.constant 0 : i32
    %c0_i32_1 = arith.constant 0 : i32
    return %c0_i32, %c0_i32_0 : i32, i32
  }
  func.func @transform_3(%arg0: i32) -> (i32, i32) {
    %c0_i32 = arith.constant 0 : i32
    %c0_i32_0 = arith.constant 0 : i32
    return %arg0, %c0_i32 : i32, i32
  }
}

</mosaic_0001>

<bundles_post_ra>
// kernel: pallas_matmul.1
= control target key start
LH: loop header
LB: loop body
LE: loop exit
PB: predicated region body
PF: predicated region fallthrough
CT: control target
= control target key end

     0   :  { %vm198_vm0 = vcmask 1044480   ;;  %vm199_vm1 = vcmask 1045504   ;;  %vm149_vm2 = vcmask 220160   ;;  %v707_v1 = vmov 65535   ;;  %s963_s1 = inlined_call_operand.vmem [shape: bf16[27,32], index: 1, kind: input, shape index: {}]   ;;  %s964_s0 = inlined_call_operand.vmem [shape: bf16[256,27], index: 0, kind: input, shape index: {}]   ;;  %s965_s2 = inlined_call_operand.vmem [shape: f32[1,32], index: 2, kind: input, shape index: {}]   ;;  %s966_s3 = inlined_call_operand.vmem [shape: bf16[256,32], index: 3, kind: output, shape index: {}]  }
   0x1   :  { %v689_v0 = vld [vmem:[%s963_s1] sm:$0xff]   ;;  %v200_v2 = vsel %vm198_vm0, 4294967295, %v707_v1  ;;  %v690_v3 = vld [vmem:[%s963_s1 + $0x8] sm:$0x3f]   ;;  %v695_v10 = vld [vmem:[%s964_s0 + $0x10] sm:$0xff]   ;;  %vm494_vm3 = vcmask 257024  }
   0x2   :  { %648 = vmatprep.subr.bf16.mxu0 %v689_v0  ;;  %684 = vmatprep.subr.bf16.mxu1 %v689_v0  ;;  %v201_v4 = vsel %vm199_vm1, %v200_v2, 0  ;;  %v691_v5 = vld [vmem:[%s964_s0] sm:$0xff]   ;;  %v693_v8 = vld [vmem:[%s964_s0 + $0x8] sm:$0xff]   ;;  %v696_v11 = vld [vmem:[%s964_s0 + $0x50] sm:$0xff]  }
   0x3   :  { %649 = vmatpush3.bf16.msra.mxu0 %v689_v0  ;;  %686 = vmatpush3.bf16.msra.mxu1 %v689_v0  ;;  %v203_v6 = vand.u32 %v690_v3, %v201_v4  ;;  %v692_v7 = vld [vmem:[%s964_s0 + $0x40] sm:$0xff]   ;;  %v694_v9 = vld [vmem:[%s964_s0 + $0x48] sm:$0xff]   ;;  %v697_v12 = vld [vmem:[%s964_s0 + $0x18] sm:$0xff]  }
   0x4   :  { %652 = vmatprep.mubr.msk.bf16.mxu0 %vm149_vm2, %v691_v5  ;;  %668 = vmatprep.mubr.msk.bf16.mxu1 %vm149_vm2, %v692_v7  ;;  %v698_v13 = vld [vmem:[%s964_s0 + $0x58] sm:$0xff]   ;;  %v699_v14 = vld [vmem:[%s964_s0 + $0x20] sm:$0xff]   ;;  %v701_v16 = vld [vmem:[%s964_s0 + $0x28] sm:$0xff]  }
   0x5   :  { %650 = vmatprep.subr.bf16.mxu0 %v203_v6  ;;  %685 = vmatprep.subr.bf16.mxu1 %v203_v6  ;;  %v700_v15 = vld [vmem:[%s964_s0 + $0x60] sm:$0xff]   ;;  %v702_v17 = vld [vmem:[%s964_s0 + $0x68] sm:$0xff]   ;;  %v703_v18 = vld [vmem:[%s964_s0 + $0x30] sm:$0xff]  }
   0x6   :  { %v704_v19 = vld [vmem:[%s964_s0 + $0x70] sm:$0xff]   ;;  %v705_v20 = vld [vmem:[%s964_s0 + $0x38] sm:$0xff]   ;;  %v801_v22 = vld [vmem:[%s965_s2] ss:$0 sm:$0xff] }
   0x7   :  { %651 = vmatpush3.bf16.msra.mxu0 %v203_v6  ;;  %687 = vmatpush3.bf16.msra.mxu1 %v203_v6  ;;  %v706_v21 = vld [vmem:[%s964_s0 + $0x78] sm:$0xff]  }
   0xa   :  { %653 = vmatmul.mubr.msk.bf16.vlgmr.msra.gmra.mrb[0].mxu0 %vm149_vm2, %v693_v8  ;;  %669 = vmatmul.mubr.msk.bf16.vlgmr.msra.gmra.mrb[0].mxu1 %vm149_vm2, %v694_v9 }
   0xb   :  { %656 = vmatprep.mubr.msk.bf16.mxu0 %vm149_vm2, %v695_v10  ;;  %672 = vmatprep.mubr.msk.bf16.mxu1 %vm149_vm2, %v696_v11 }
  0x12   :  { %657 = vmatmul.mubr.msk.bf16.gmra.mrb[4].mxu0 %vm149_vm2, %v697_v12  ;;  %673 = vmatmul.mubr.msk.bf16.gmra.mrb[4].mxu1 %vm149_vm2, %v698_v13 }
  0x13   :  { %660 = vmatprep.mubr.msk.bf16.mxu0 %vm149_vm2, %v699_v14  ;;  %676 = vmatprep.mubr.msk.bf16.mxu1 %vm149_vm2, %v700_v15 }
  0x1a   :  { %661 = vmatmul.mubr.msk.bf16.gmra.mrb[8].mxu0 %vm149_vm2, %v701_v16  ;;  %677 = vmatmul.mubr.msk.bf16.gmra.mrb[8].mxu1 %vm149_vm2, %v702_v17 }
  0x1b   :  { %664 = vmatprep.mubr.msk.bf16.mxu0 %vm149_vm2, %v703_v18  ;;  %680 = vmatprep.mubr.msk.bf16.mxu1 %vm149_vm2, %v704_v19 }
  0x22   :  { %665 = vmatmul.mubr.msk.bf16.gmra.mrb[12].mxu0 %vm149_vm2, %v705_v20  ;;  %681 = vmatmul.mubr.msk.bf16.gmra.mrb[12].mxu1 %vm149_vm2, %v706_v21 }
  0xdd   :  { %v654_v23 = vpop.f32.mrb[0].mxu0  ;;  %v670_v24 = vpop.f32.mrb[0].mxu1 }
  0xde   :  { %v248_v25 = vadd.f32 %v654_v23, %v801_v22  ;;  %v312_v26 = vadd.f32 %v670_v24, %v801_v22  ;;  %v239_v27 = vpop.f32.mrb[1].mxu0  ;;  %v303_v28 = vpop.f32.mrb[1].mxu1 }
  0xdf   :  { %v240_v29 = vadd.f32 %v801_v22, %v239_v27  ;;  %v304_v30 = vadd.f32 %v801_v22, %v303_v28  ;;  %v655_v31 = vpop.f32.mrb[2].mxu0  ;;  %v671_v32 = vpop.f32.mrb[2].mxu1 }
  0xe0   :  { %v600_v33 = vpack.c.bf16 %v248_v25, %v248_v25  ;;  %v616_v34 = vpack.c.bf16 %v312_v26, %v312_v26  ;;  %v251_v35 = vadd.f32 %v655_v31, %v801_v22  ;;  %v315_v36 = vadd.f32 %v671_v32, %v801_v22  ;;  %v242_v37 = vpop.f32.mrb[3].mxu0  ;;  %v306_v38 = vpop.f32.mrb[3].mxu1 }
  0xe1   :  { %v598_v39 = vpack.c.bf16 %v240_v29, %v240_v29  ;;  %v614_v40 = vpack.c.bf16 %v304_v30, %v304_v30  ;;  %v243_v41 = vadd.f32 %v801_v22, %v242_v37  ;;  %v307_v42 = vadd.f32 %v801_v22, %v306_v38 }
  0xe2   :  { %497 = vst.msk [vmem:[%s966_s3 + $0x8] sm:$0xf] %vm494_vm3, %v600_v33  ;;  %513 = vst.msk [vmem:[%s966_s3 + $0x48] sm:$0xf] %vm494_vm3, %v616_v34  ;;  %v601_v43 = vpack.c.bf16 %v251_v35, %v251_v35  ;;  %v617_v44 = vpack.c.bf16 %v315_v36, %v315_v36 }
  0xe3   :  { %495 = vst.msk [vmem:[%s966_s3] sm:$0xf] %vm494_vm3, %v598_v39  ;;  %511 = vst.msk [vmem:[%s966_s3 + $0x40] sm:$0xf] %vm494_vm3, %v614_v40  ;;  %v599_v45 = vpack.c.bf16 %v243_v41, %v243_v41  ;;  %v615_v46 = vpack.c.bf16 %v307_v42, %v307_v42 }
  0xe4   :  { %498 = vst.msk [vmem:[%s966_s3 + $0xc] sm:$0xf] %vm494_vm3, %v601_v43  ;;  %514 = vst.msk [vmem:[%s966_s3 + $0x4c] sm:$0xf] %vm494_vm3, %v617_v44 }
  0xe5   :  { %496 = vst.msk [vmem:[%s966_s3 + $0x4] sm:$0xf] %vm494_vm3, %v599_v45  ;;  %512 = vst.msk [vmem:[%s966_s3 + $0x44] sm:$0xf] %vm494_vm3, %v615_v46  ;;  %v658_v47 = vpop.f32.mrb[4].mxu0  ;;  %v674_v48 = vpop.f32.mrb[4].mxu1 }
  0xe6   :  { %v264_v49 = vadd.f32 %v658_v47, %v801_v22  ;;  %v328_v50 = vadd.f32 %v674_v48, %v801_v22  ;;  %v255_v51 = vpop.f32.mrb[5].mxu0  ;;  %v319_v52 = vpop.f32.mrb[5].mxu1 }
  0xe7   :  { %v256_v53 = vadd.f32 %v801_v22, %v255_v51  ;;  %v320_v54 = vadd.f32 %v801_v22, %v319_v52  ;;  %v659_v55 = vpop.f32.mrb[6].mxu0  ;;  %v675_v56 = vpop.f32.mrb[6].mxu1 }
  0xe8   :  { %v604_v57 = vpack.c.bf16 %v264_v49, %v264_v49  ;;  %v620_v58 = vpack.c.bf16 %v328_v50, %v328_v50  ;;  %v267_v59 = vadd.f32 %v659_v55, %v801_v22  ;;  %v331_v60 = vadd.f32 %v675_v56, %v801_v22  ;;  %v258_v61 = vpop.f32.mrb[7].mxu0  ;;  %v322_v62 = vpop.f32.mrb[7].mxu1 }
  0xe9   :  { %v602_v63 = vpack.c.bf16 %v256_v53, %v256_v53  ;;  %v618_v0 = vpack.c.bf16 %v320_v54, %v320_v54  ;;  %v259_v1 = vadd.f32 %v801_v22, %v258_v61  ;;  %v323_v2 = vadd.f32 %v801_v22, %v322_v62 }
  0xea   :  { %501 = vst.msk [vmem:[%s966_s3 + $0x18] sm:$0xf] %vm494_vm3, %v604_v57  ;;  %517 = vst.msk [vmem:[%s966_s3 + $0x58] sm:$0xf] %vm494_vm3, %v620_v58  ;;  %v605_v3 = vpack.c.bf16 %v267_v59, %v267_v59  ;;  %v621_v4 = vpack.c.bf16 %v331_v60, %v331_v60 }
  0xeb   :  { %499 = vst.msk [vmem:[%s966_s3 + $0x10] sm:$0xf] %vm494_vm3, %v602_v63  ;;  %515 = vst.msk [vmem:[%s966_s3 + $0x50] sm:$0xf] %vm494_vm3, %v618_v0  ;;  %v603_v5 = vpack.c.bf16 %v259_v1, %v259_v1  ;;  %v619_v6 = vpack.c.bf16 %v323_v2, %v323_v2 }
  0xec   :  { %502 = vst.msk [vmem:[%s966_s3 + $0x1c] sm:$0xf] %vm494_vm3, %v605_v3  ;;  %518 = vst.msk [vmem:[%s966_s3 + $0x5c] sm:$0xf] %vm494_vm3, %v621_v4 }
  0xed   :  { %500 = vst.msk [vmem:[%s966_s3 + $0x14] sm:$0xf] %vm494_vm3, %v603_v5  ;;  %516 = vst.msk [vmem:[%s966_s3 + $0x54] sm:$0xf] %vm494_vm3, %v619_v6  ;;  %v662_v7 = vpop.f32.mrb[8].mxu0  ;;  %v678_v8 = vpop.f32.mrb[8].mxu1 }
  0xee   :  { %v280_v9 = vadd.f32 %v662_v7, %v801_v22  ;;  %v344_v10 = vadd.f32 %v678_v8, %v801_v22  ;;  %v271_v11 = vpop.f32.mrb[9].mxu0  ;;  %v335_v12 = vpop.f32.mrb[9].mxu1 }
  0xef   :  { %v272_v13 = vadd.f32 %v801_v22, %v271_v11  ;;  %v336_v14 = vadd.f32 %v801_v22, %v335_v12  ;;  %v663_v15 = vpop.f32.mrb[10].mxu0  ;;  %v679_v16 = vpop.f32.mrb[10].mxu1 }
  0xf0   :  { %v608_v17 = vpack.c.bf16 %v280_v9, %v280_v9  ;;  %v624_v18 = vpack.c.bf16 %v344_v10, %v344_v10  ;;  %v283_v19 = vadd.f32 %v663_v15, %v801_v22  ;;  %v347_v20 = vadd.f32 %v679_v16, %v801_v22  ;;  %v274_v21 = vpop.f32.mrb[11].mxu0  ;;  %v338_v23 = vpop.f32.mrb[11].mxu1 }
  0xf1   :  { %v606_v24 = vpack.c.bf16 %v272_v13, %v272_v13  ;;  %v622_v25 = vpack.c.bf16 %v336_v14, %v336_v14  ;;  %v275_v26 = vadd.f32 %v801_v22, %v274_v21  ;;  %v339_v27 = vadd.f32 %v801_v22, %v338_v23 }
  0xf2   :  { %505 = vst.msk [vmem:[%s966_s3 + $0x28] sm:$0xf] %vm494_vm3, %v608_v17  ;;  %521 = vst.msk [vmem:[%s966_s3 + $0x68] sm:$0xf] %vm494_vm3, %v624_v18  ;;  %v609_v28 = vpack.c.bf16 %v283_v19, %v283_v19  ;;  %v625_v29 = vpack.c.bf16 %v347_v20, %v347_v20 }
  0xf3   :  { %503 = vst.msk [vmem:[%s966_s3 + $0x20] sm:$0xf] %vm494_vm3, %v606_v24  ;;  %519 = vst.msk [vmem:[%s966_s3 + $0x60] sm:$0xf] %vm494_vm3, %v622_v25  ;;  %v607_v30 = vpack.c.bf16 %v275_v26, %v275_v26  ;;  %v623_v31 = vpack.c.bf16 %v339_v27, %v339_v27 }
  0xf4   :  { %506 = vst.msk [vmem:[%s966_s3 + $0x2c] sm:$0xf] %vm494_vm3, %v609_v28  ;;  %522 = vst.msk [vmem:[%s966_s3 + $0x6c] sm:$0xf] %vm494_vm3, %v625_v29 }
  0xf5   :  { %504 = vst.msk [vmem:[%s966_s3 + $0x24] sm:$0xf] %vm494_vm3, %v607_v30  ;;  %520 = vst.msk [vmem:[%s966_s3 + $0x64] sm:$0xf] %vm494_vm3, %v623_v31  ;;  %v666_v32 = vpop.f32.mrb[12].mxu0  ;;  %v682_v33 = vpop.f32.mrb[12].mxu1 }
  0xf6   :  { %v296_v34 = vadd.f32 %v666_v32, %v801_v22  ;;  %v360_v35 = vadd.f32 %v682_v33, %v801_v22  ;;  %v287_v36 = vpop.f32.mrb[13].mxu0  ;;  %v351_v37 = vpop.f32.mrb[13].mxu1 }
  0xf7   :  { %v288_v38 = vadd.f32 %v801_v22, %v287_v36  ;;  %v352_v39 = vadd.f32 %v801_v22, %v351_v37  ;;  %v667_v40 = vpop.f32.mrb[14].mxu0  ;;  %v683_v41 = vpop.f32.mrb[14].mxu1 }
  0xf8   :  { %v612_v42 = vpack.c.bf16 %v296_v34, %v296_v34  ;;  %v628_v43 = vpack.c.bf16 %v360_v35, %v360_v35  ;;  %v299_v44 = vadd.f32 %v667_v40, %v801_v22  ;;  %v363_v45 = vadd.f32 %v683_v41, %v801_v22  ;;  %v290_v46 = vpop.f32.mrb[15].mxu0  ;;  %v354_v47 = vpop.f32.mrb[15].mxu1 }
  0xf9   :  { %v610_v48 = vpack.c.bf16 %v288_v38, %v288_v38  ;;  %v626_v49 = vpack.c.bf16 %v352_v39, %v352_v39  ;;  %v291_v50 = vadd.f32 %v801_v22, %v290_v46  ;;  %v355_v51 = vadd.f32 %v801_v22, %v354_v47 }
  0xfa   :  { %509 = vst.msk [vmem:[%s966_s3 + $0x38] sm:$0xf] %vm494_vm3, %v612_v42  ;;  %525 = vst.msk [vmem:[%s966_s3 + $0x78] sm:$0xf] %vm494_vm3, %v628_v43  ;;  %v613_v52 = vpack.c.bf16 %v299_v44, %v299_v44  ;;  %v629_v53 = vpack.c.bf16 %v363_v45, %v363_v45 }
  0xfb   :  { %507 = vst.msk [vmem:[%s966_s3 + $0x30] sm:$0xf] %vm494_vm3, %v610_v48  ;;  %523 = vst.msk [vmem:[%s966_s3 + $0x70] sm:$0xf] %vm494_vm3, %v626_v49  ;;  %v611_v22 = vpack.c.bf16 %v291_v50, %v291_v50  ;;  %v627_v54 = vpack.c.bf16 %v355_v51, %v355_v51 }
  0xfc   :  { %510 = vst.msk [vmem:[%s966_s3 + $0x3c] sm:$0xf] %vm494_vm3, %v613_v52  ;;  %526 = vst.msk [vmem:[%s966_s3 + $0x7c] sm:$0xf] %vm494_vm3, %v629_v53 }
  0xfd   :  { %508 = vst.msk [vmem:[%s966_s3 + $0x34] sm:$0xf] %vm494_vm3, %v611_v22  ;;  %524 = vst.msk [vmem:[%s966_s3 + $0x74] sm:$0xf] %vm494_vm3, %v627_v54 }

</bundles_post_ra>
